<compile_context>
chip_gen: v7x
topology: tpu7x:2x2x1
jax: 0.10.0
libtpu: 0.0.40
codegen_flags: <defaults>
</compile_context>

<pallas_src>
import jax
import jax.numpy as jnp
import numpy as np
from jax.experimental import pallas as pl
from jax.experimental.pallas import tpu as pltpu

N_ROUND = 3            # as in the PyTorch module
STYLE_DIM = 256        # StyleTTS2 style vector: 128 acoustic + 128 prosody
ACOUSTIC_DIM = 128
N_REF = 2              # the module asserts len(reference_styles) == 2
MEL_MEAN = -4.0
MEL_STD = 4.0
INV_STD = 1.0 / MEL_STD
NORM_OFFSET = -MEL_MEAN / MEL_STD   # fold (x - mean)/std into x*inv_std + offset

# Per-VMEM-buffer byte budget for the tiled mel path.  With BlockSpec
# multi-buffering this means roughly 3 input + 2 output buffers live at once
# (~5 x budget = 15 MiB), well inside the 32 MiB scoped default on every
# listed generation, including v7x's smaller 64 MiB physical VMEM.
_PER_BUFFER_VMEM_BUDGET = 3 << 20   # 3 MiB

# Below this total size the custom-call / pipeline setup overhead dominates and
# a single whole-array block is cheaper than a grid.
_SINGLE_BLOCK_MAX_BYTES = 256 << 10   # 256 KiB

# Minimum number of grid steps for the tiled path: enough for the BlockSpec
# pipeline to overlap DMA with compute, and for a balanced 2-TensorCore split
# on v7x via dimension_semantics=("parallel",).
_MIN_GRID_STEPS = 8


# ----------------------------------------------------------------------------
# Kernel: mel log-normalization from compute_style()'s preprocess()
#   mel_norm = (log(1e-5 + mel) - mean) / std   ==  log(mel + 1e-5)*INV + OFF
# ----------------------------------------------------------------------------
def mel_norm_kernel(mel_ref, out_ref):
    x = mel_ref[...].astype(jnp.float32)          # keep log/FMA in f32 (v5e has no bf16 EUP)
    y = jnp.log(x + 1e-5) * INV_STD + NORM_OFFSET
    out_ref[...] = y.astype(out_ref.dtype)        # cast only at the store


def _pick_tile_t(B, M, T, itemsize):
    """Lane-aligned T tile: within the per-buffer VMEM budget, small enough to
    give >= _MIN_GRID_STEPS grid steps, and preferring an exact divisor of T so
    the final grid step is a full, unmasked lane-dense store."""
    bytes_per_col = max(1, B * M * itemsize)
    budget_t = (_PER_BUFFER_VMEM_BUDGET // bytes_per_col) // 128 * 128
    steps_t = (T // _MIN_GRID_STEPS) // 128 * 128
    cap = max(128, min(budget_t, steps_t))
    # Bounded search for a divisor tile (avoids a ragged masked-store tail).
    lo = max(127, cap - 32 * 128)
    for t in range(cap, lo, -128):
        if t >= 128 and T % t == 0:
            return t
    return cap


def mel_normalize(mel, *, tile_t=None, out_dtype=None, donate_input=False):
    """Elementwise mel log-normalization.

    tile_t=None      -> auto: whole array as one block only if it is tiny
                        (<= 256 KiB) or too short to tile along T; otherwise a
                        lane-aligned tile giving >= 8 pipelined grid steps.
    out_dtype        -> defaults to mel.dtype (bf16 in -> bf16 out halves the
                        write stream on this bandwidth-bound pass).
    donate_input     -> alias the output onto the input HBM buffer when the raw
                        mel is not needed after preprocessing (dtypes must match).
    """
    B, M, T = mel.shape
    out_dtype = jnp.dtype(mel.dtype) if out_dtype is None else jnp.dtype(out_dtype)
    itemsize = max(jnp.dtype(mel.dtype).itemsize, out_dtype.itemsize)
    out_shape = jax.ShapeDtypeStruct((B, M, T), out_dtype)
    io_aliases = {0: 0} if (donate_input and jnp.dtype(mel.dtype) == out_dtype) else {}

    if tile_t is None:
        total_bytes = B * M * T * itemsize
        if total_bytes <= _SINGLE_BLOCK_MAX_BYTES or T < 2 * 128:
            tile_t = T            # tiny / untileable along T: one block
        else:
            tile_t = _pick_tile_t(B, M, T, itemsize)

    if tile_t >= T:
        # Tiny-mel fast path only: launch overhead dominates, one DMA in/out.
        vmem = pl.BlockSpec(memory_space=pltpu.MemorySpace.VMEM)
        return pl.pallas_call(
            mel_norm_kernel,
            out_shape=out_shape,
            in_specs=[vmem],
            out_specs=vmem,
            input_output_aliases=io_aliases,
        )(mel)

    # Gridded, pipelined path: big lane-aligned tiles along T so the ~0.35 us
    # per-grid-step overhead is amortized while DMA and the log/FMA overlap;
    # T axis marked parallel so it shards across both TensorCores on v7x.
    grid = (pl.cdiv(T, tile_t),)
    return pl.pallas_call(
        mel_norm_kernel,
        out_shape=out_shape,
        grid=grid,
        in_specs=[pl.BlockSpec((B, M, tile_t), lambda t: (0, 0, t),
                               pipeline_mode=pl.Buffered(3))],
        out_specs=pl.BlockSpec((B, M, tile_t), lambda t: (0, 0, t)),
        compiler_params=pltpu.CompilerParams(
            dimension_semantics=("parallel",)),
        input_output_aliases=io_aliases,
    )(mel)


# ----------------------------------------------------------------------------
# Style assembly from StyleTalker.forward() -- plain JAX (per review).
# Total data touched is ~5 KiB of f32; a pallas_call here is pure launch
# overhead and its (4,256)/(1,256) outputs are below the (8,128) tile, so XLA
# fusion of these concatenations/slices is strictly cheaper.
# ----------------------------------------------------------------------------
def style_assemble(history_styles, est_prosody, reference_styles=None,
                   speaker_identity=None):
    history_styles = history_styles.astype(jnp.float32)
    est_prosody = est_prosody.astype(jnp.float32)
    if reference_styles is None:
        # default: reference_styles = [history_styles[0], history_styles[1]]
        reference_styles = history_styles[:N_REF]
    else:
        reference_styles = reference_styles.astype(jnp.float32)
    input_styles = jnp.concatenate([reference_styles, history_styles], axis=0)
    if speaker_identity is None:
        speaker_identity = history_styles[-1:, :ACOUSTIC_DIM]       # (1, 128)
    est_style = jnp.concatenate(
        [speaker_identity, est_prosody[:, ACOUSTIC_DIM:]], axis=1)  # (1, 256)
    return input_styles, speaker_identity, est_style


# ----------------------------------------------------------------------------
# Python wrapper mirroring StyleTalker.forward's tensor semantics.
# ----------------------------------------------------------------------------
def styletalker_forward(history_styles, est_prosody, reference_styles=None,
                        speaker_identity=None):
    """history_styles: (N_ROUND-1, STYLE_DIM), est_prosody: (1, STYLE_DIM)."""
    assert history_styles.shape[0] == N_ROUND - 1
    if reference_styles is not None:
        assert reference_styles.shape[0] == N_REF
    # TODO(synk): StyleQwen (Qwen-Audio LLM) producing (est_text, est_prosody)
    #             is an external black box; est_prosody is passed in here.
    input_styles, speaker_identity, est_style = style_assemble(
        history_styles, est_prosody, reference_styles, speaker_identity)
    # TODO(synk): StyleTTS2 waveform synthesis from est_style and the ASR
    #             pipeline have no architecture visible in this module.
    return input_styles, speaker_identity, est_style


if __name__ == "__main__":
    key = jax.random.PRNGKey(0)
    k1, k2, k3, k4, k5, k6 = jax.random.split(key, 6)

    # Two history style vectors (N_ROUND - 1 = 2) and one estimated prosody
    # vector standing in for the audio-LLM output.
    history_styles = jax.random.normal(k1, (N_ROUND - 1, STYLE_DIM), jnp.float32)
    est_prosody = jax.random.normal(k2, (1, STYLE_DIM), jnp.float32)

    # Positive mel magnitudes, channels-first like PyTorch: (B, n_mels, T).
    mel_tiny = jax.nn.softplus(jax.random.normal(k3, (1, 80, 192), jnp.float32)) + 1e-3
    mel_mid = jax.nn.softplus(jax.random.normal(k4, (1, 80, 1024), jnp.float32)) + 1e-3
    mel_ragged = jax.nn.softplus(jax.random.normal(k5, (1, 80, 1000), jnp.float32)) + 1e-3
    mel_bf16 = (jax.nn.softplus(jax.random.normal(k6, (1, 80, 2048), jnp.float32))
                + 1e-3).astype(jnp.bfloat16)

    # --- run kernels ---
    out_tiny = mel_normalize(mel_tiny)                    # single-block path (tiny)
    out_mid = mel_normalize(mel_mid)                      # gridded path, 8 full tiles
    out_ragged = mel_normalize(mel_ragged)                # gridded path, masked tail tile
    out_bf16 = mel_normalize(mel_bf16)                    # bf16 in -> bf16 out

    # Default reference_styles (history rows 0 and 1).
    in_styles_a, spk_a, est_a = styletalker_forward(history_styles, est_prosody)
    # Explicit reference_styles path.
    refs = jnp.stack([history_styles[1], history_styles[0]])
    in_styles_b, spk_b, est_b = styletalker_forward(
        history_styles, est_prosody, reference_styles=refs)

    jax.block_until_ready(
        (out_tiny, out_mid, out_ragged, out_bf16,
         in_styles_a, spk_a, est_a, in_styles_b, spk_b, est_b))

    # --- plain-JAX references mirroring the PyTorch semantics ---
    def mel_ref_fn(mel):
        return (jnp.log(1e-5 + mel.astype(jnp.float32)) - MEL_MEAN) / MEL_STD

    def style_ref_fn(hist, pros, refs=None):
        if refs is None:
            refs = jnp.stack([hist[0], hist[1]])
        in_styles = jnp.concatenate([refs, hist], axis=0)
        spk = hist[-1][:ACOUSTIC_DIM][None, :]
        est = jnp.concatenate([spk, pros[:, ACOUSTIC_DIM:]], axis=1)
        return in_styles, spk, est

    for got, src in ((out_tiny, mel_tiny), (out_mid, mel_mid), (out_ragged, mel_ragged)):
        np.testing.assert_allclose(np.asarray(got), np.asarray(mel_ref_fn(src)),
                                   rtol=1e-5, atol=1e-5)
    np.testing.assert_allclose(np.asarray(out_bf16.astype(jnp.float32)),
                               np.asarray(mel_ref_fn(mel_bf16)),
                               rtol=2e-2, atol=2e-2)

    for (in_s, spk, est), ref in (
            ((in_styles_a, spk_a, est_a), style_ref_fn(history_styles, est_prosody)),
            ((in_styles_b, spk_b, est_b), style_ref_fn(history_styles, est_prosody, refs))):
        in_ref, spk_ref, est_ref = ref
        np.testing.assert_allclose(np.asarray(in_s), np.asarray(in_ref), rtol=1e-6, atol=1e-6)
        np.testing.assert_allclose(np.asarray(spk), np.asarray(spk_ref), rtol=1e-6, atol=1e-6)
        np.testing.assert_allclose(np.asarray(est), np.asarray(est_ref), rtol=1e-6, atol=1e-6)

    print("KERNEL_OK")
</pallas_src>

<mosaic_0001>
module attributes {stable_mosaic.version = 11 : i64} {
  func.func @mel_norm_kernel(%arg0: memref<1x80x192xf32, #tpu.memory_space<vmem>>, %arg1: memref<1x80x192xf32, #tpu.memory_space<vmem>>) attributes {dimension_semantics = [], scalar_prefetch = 0 : i64, scratch_operands = 0 : i64, tpu.core_type = #tpu.core_type<tc>} {
    %c0 = arith.constant 0 : index
    %c0_0 = arith.constant 0 : index
    %c0_1 = arith.constant 0 : index
    %0 = vector.load %arg0[%c0, %c0_0, %c0_1] : memref<1x80x192xf32, #tpu.memory_space<vmem>>, vector<1x80x192xf32>
    %cst = arith.constant 9.99999974E-6 : f32
    %1 = vector.broadcast %cst : f32 to vector<1x80x192xf32>
    %2 = arith.addf %0, %1 : vector<1x80x192xf32>
    %3 = math.log %2 : vector<1x80x192xf32>
    %cst_2 = arith.constant 2.500000e-01 : f32
    %4 = vector.broadcast %cst_2 : f32 to vector<1x80x192xf32>
    %5 = arith.mulf %3, %4 : vector<1x80x192xf32>
    %cst_3 = arith.constant 1.000000e+00 : f32
    %6 = vector.broadcast %cst_3 : f32 to vector<1x80x192xf32>
    %7 = arith.addf %5, %6 : vector<1x80x192xf32>
    %c0_4 = arith.constant 0 : index
    %c0_5 = arith.constant 0 : index
    %c0_6 = arith.constant 0 : index
    %8 = vector.load %arg1[%c0_4, %c0_5, %c0_6] : memref<1x80x192xf32, #tpu.memory_space<vmem>>, vector<1x80x192xf32>
    tpu.vector_store %arg1[%c0_4, %c0_5, %c0_6], %7 {strides = array<i32>} : memref<1x80x192xf32, #tpu.memory_space<vmem>>, vector<1x80x192xf32>,
    return
  }
}

</mosaic_0001>

<bundles_post_ra>
// kernel: tpu_custom_call.1
= control target key start
LH: loop header
LB: loop body
LE: loop exit
PB: predicated region body
PF: predicated region fallthrough
CT: control target
= control target key end

     0   :  { %6 = vsyncpa [#allocation3], 0  ;;  %s327_s0 = inlined_call_operand.hbm [shape: f32[1,80,192], index: 0, kind: input, shape index: {}]   ;;  %s328_s1 = inlined_call_operand.hbm [shape: f32[1,80,192], index: 1, kind: output, shape index: {}]  }
   0x1   :  { %7 = vsyncpa [#allocation4], 0  ;;  %s273_s6 = smov [#allocation2]   ;;  %s225_s10 = scalar_lea.hbm %s327_s0, 2560 }
   0x2   :  { %s13_s7 = sshll.u32 %s273_s6, 4  ;;  %p226_p0 = scmp.ne.s32.totalorder %s327_s0, %s225_s10  ;;  %s14_s7 = int_to_ptr.vmem [resolvable:$true] %s13_s7 }
   0x3   :  { %p229_p1 = scmp.lt.u32.totalorder %s225_s10, %s327_s0 }
   0x5   :  { %p231_p2 = pnand %p229_p1, %p226_p0 }
   0x7   :  { %234 = shalt.err (!%p231_p2)
}
   0x8   :  { %s235_s15 = scalar_lea.vmem %s14_s7, 2560  ;;  %p240_p4 = scmp.lt.s32.totalorder %s14_s7, %s14_s7 }
   0x9   :  { %p236_p3 = scmp.ne.s32.totalorder %s14_s7, %s235_s15  ;;  %p241_p5 = scmp.lt.s32.totalorder %s235_s15, %s235_s15 }
   0xb   :  { %p242_p6 = por %p241_p5, %p240_p4 }
   0xd   :  { %p243_p7 = pnand %p242_p6, %p236_p3 }
   0xf   :  { %246 = shalt.err (!%p243_p7)
}
  0x10   :  { %s274_s16 = smov 256   ;;  %s275_s17 = smov 16  }
  0x11   :  { %19 = dma.hbm_to_vmem [thread:$0]  %s327_s0, 2560, %s14_s7, [#allocation3], %s274_s16, %s274_s16, %s275_s17  }
  0x12   :  { %269 = dma.done.wait [#allocation3], 2560  }
  0x13   :  { %270 = vsyncadd [#allocation3], 4294964736  ;;  %v23_v0 = vld [vmem:[#allocation2] sm:$0xff]  ;;  %v24_v1 = vld [vmem:[#allocation2 + $0x8] sm:$0xff]  ;;  %vm144_vm0 = vcmask 523264   ;;  %s276_s0 = smov [#allocation5]  }
  0x14   :  { %v25_v2 = vld [vmem:[#allocation2 + $0x10] sm:$0xff]  ;;  %v43_v3 = vadd.f32 1e-05, %v23_v0  ;;  %v44_v4 = vadd.f32 1e-05, %v24_v1  ;;  %v26_v6 = vld [vmem:[#allocation2 + $0x18] sm:$0xff] }
  0x15   :  { %v45_v5 = vadd.f32 1e-05, %v25_v2  ;;  %v27_v7 = vld [vmem:[#allocation2 + $0x20] sm:$0xff]  ;;  %v28_v8 = vld [vmem:[#allocation2 + $0x28] sm:$0xff]  ;;  %v46_v9 = vadd.f32 1e-05, %v26_v6 }
  0x16   :  { %185 = vlog2.f32 %v43_v3  ;;  %v47_v10 = vadd.f32 1e-05, %v27_v7  ;;  %v48_v11 = vadd.f32 1e-05, %v28_v8  ;;  %v29_v12 = vld [vmem:[#allocation2 + $0x30] sm:$0xff]  ;;  %v30_v13 = vld [vmem:[#allocation2 + $0x38] sm:$0xff] }
  0x17   :  { %187 = vlog2.f32 %v44_v4  ;;  %v31_v14 = vld [vmem:[#allocation2 + $0x40] sm:$0xff]  ;;  %v49_v15 = vadd.f32 1e-05, %v29_v12  ;;  %v50_v16 = vadd.f32 1e-05, %v30_v13  ;;  %v32_v17 = vld [vmem:[#allocation2 + $0x48] sm:$0xff] }
  0x18   :  { %189 = vlog2.f32 %v45_v5  ;;  %v33_v18 = vld [vmem:[#allocation2 + $0x50] sm:$0xff]  ;;  %v51_v19 = vadd.f32 1e-05, %v31_v14  ;;  %v34_v20 = vld [vmem:[#allocation2 + $0x58] sm:$0xff]  ;;  %v52_v21 = vadd.f32 1e-05, %v32_v17 }
  0x19   :  { %191 = vlog2.f32 %v46_v9  ;;  %v35_v22 = vld [vmem:[#allocation2 + $0x60] sm:$0xff]  ;;  %v53_v23 = vadd.f32 1e-05, %v33_v18  ;;  %v36_v24 = vld [vmem:[#allocation2 + $0x68] sm:$0xff]  ;;  %v54_v25 = vadd.f32 1e-05, %v34_v20 }
  0x1a   :  { %193 = vlog2.f32 %v47_v10  ;;  %v37_v26 = vld [vmem:[#allocation2 + $0x70] sm:$0xff]  ;;  %v55_v27 = vadd.f32 1e-05, %v35_v22  ;;  %v38_v28 = vld [vmem:[#allocation2 + $0x78] sm:$0xff]  ;;  %v56_v29 = vadd.f32 1e-05, %v36_v24 }
  0x1b   :  { %195 = vlog2.f32 %v48_v11  ;;  %v39_v30 = vld [vmem:[#allocation2 + $0x80] sm:$0xff]  ;;  %v40_v31 = vld [vmem:[#allocation2 + $0x88] sm:$0xff]  ;;  %v57_v33 = vadd.f32 1e-05, %v37_v26  ;;  %v41_v34 = vld [vmem:[#allocation2 + $0x90] sm:$0xff]  ;;  %s169_s20 = sshll.u32 %s276_s0, 4  ;;  %s170_s20 = int_to_ptr.vmem [resolvable:$true] %s169_s20 }
  0x1c   :  { %197 = vlog2.f32 %v49_v15  ;;  %v58_v37 = vadd.f32 1e-05, %v38_v28  ;;  %v42_v38 = vld [vmem:[#allocation2 + $0x98] sm:$0xff]  ;;  %v59_v41 = vadd.f32 1e-05, %v39_v30  ;;  %s247_s21 = scalar_lea.vmem %s170_s20, 2560  ;;  %p252_p9 = scmp.lt.s32.totalorder %s170_s20, %s170_s20 }
  0x1d   :  { %199 = vlog2.f32 %v50_v16  ;;  %v60_v42 = vadd.f32 1e-05, %v40_v31  ;;  %v61_v46 = vadd.f32 1e-05, %v41_v34  ;;  %v62_v50 = vadd.f32 1e-05, %v42_v38  ;;  %p248_p8 = scmp.ne.s32.totalorder %s170_s20, %s247_s21  ;;  %p253_p10 = scmp.lt.s32.totalorder %s247_s21, %s247_s21 }
  0x1e   :  { %201 = vlog2.f32 %v51_v19 }
  0x1f   :  { %203 = vlog2.f32 %v52_v21  ;;  %p254_p11 = por %p253_p10, %p252_p9 }
  0x20   :  { %v186_v32 = vpop.eup %185  ;;  %205 = vlog2.f32 %v53_v23 }
  0x21   :  { %v188_v35 = vpop.eup %187  ;;  %v64_v36 = vmul.f32 0.6931472, %v186_v32  ;;  %207 = vlog2.f32 %v54_v25  ;;  %p255_p12 = pnand %p254_p11, %p248_p8 }
  0x22   :  { %v190_v39 = vpop.eup %189  ;;  %v66_v40 = vmul.f32 0.6931472, %v188_v35  ;;  %209 = vlog2.f32 %v55_v27 }
  0x23   :  { %v192_v43 = vpop.eup %191  ;;  %v103_v44 = vmul.f32 0.25, %v64_v36  ;;  %v68_v45 = vmul.f32 0.6931472, %v190_v39  ;;  %211 = vlog2.f32 %v56_v29 }
  0x24   :  { %v194_v47 = vpop.eup %193  ;;  %v104_v48 = vmul.f32 0.25, %v66_v40  ;;  %v70_v49 = vmul.f32 0.6931472, %v192_v43  ;;  %213 = vlog2.f32 %v57_v33 }
  0x25   :  { %v196_v51 = vpop.eup %195  ;;  %v123_v52 = vadd.f32 1.0, %v103_v44  ;;  %v105_v53 = vmul.f32 0.25, %v68_v45  ;;  %v72_v54 = vmul.f32 0.6931472, %v194_v47  ;;  %215 = vlog2.f32 %v58_v37 }
  0x26   :  { %v198_v55 = vpop.eup %197  ;;  %v124_v56 = vadd.f32 1.0, %v104_v48  ;;  %v106_v57 = vmul.f32 0.25, %v70_v49  ;;  %v74_v58 = vmul.f32 0.6931472, %v196_v51  ;;  %217 = vlog2.f32 %v59_v41 }
  0x27   :  { %v200_v59 = vpop.eup %199  ;;  %143 = vst [vmem:[#allocation5] sm:$0xff] %v123_v52  ;;  %v125_v60 = vadd.f32 1.0, %v105_v53  ;;  %v107_v61 = vmul.f32 0.25, %v72_v54  ;;  %v76_v62 = vmul.f32 0.6931472, %v198_v55  ;;  %219 = vlog2.f32 %v60_v42 }
  0x28   :  { %v202_v63 = vpop.eup %201  ;;  %145 = vst.msk [vmem:[#allocation5 + $0x8] sm:$0xff] %vm144_vm0, %v124_v56  ;;  %v126_v0 = vadd.f32 1.0, %v106_v57  ;;  %v108_v1 = vmul.f32 0.25, %v74_v58  ;;  %v78_v2 = vmul.f32 0.6931472, %v200_v59  ;;  %221 = vlog2.f32 %v61_v46 }
  0x29   :  { %v204_v3 = vpop.eup %203  ;;  %146 = vst [vmem:[#allocation5 + $0x10] sm:$0xff] %v125_v60  ;;  %v127_v4 = vadd.f32 1.0, %v107_v61  ;;  %v109_v5 = vmul.f32 0.25, %v76_v62  ;;  %v80_v6 = vmul.f32 0.6931472, %v202_v63  ;;  %223 = vlog2.f32 %v62_v50 }
  0x2a   :  { %v206_v7 = vpop.eup %205  ;;  %147 = vst.msk [vmem:[#allocation5 + $0x18] sm:$0xff] %vm144_vm0, %v126_v0  ;;  %v128_v8 = vadd.f32 1.0, %v108_v1  ;;  %v110_v9 = vmul.f32 0.25, %v78_v2  ;;  %v82_v10 = vmul.f32 0.6931472, %v204_v3 }
  0x2b   :  { %v208_v11 = vpop.eup %207  ;;  %148 = vst [vmem:[#allocation5 + $0x20] sm:$0xff] %v127_v4  ;;  %v129_v12 = vadd.f32 1.0, %v109_v5  ;;  %v111_v13 = vmul.f32 0.25, %v80_v6  ;;  %v84_v14 = vmul.f32 0.6931472, %v206_v7 }
  0x2c   :  { %v210_v15 = vpop.eup %209  ;;  %149 = vst.msk [vmem:[#allocation5 + $0x28] sm:$0xff] %vm144_vm0, %v128_v8  ;;  %v130_v16 = vadd.f32 1.0, %v110_v9  ;;  %v112_v17 = vmul.f32 0.25, %v82_v10  ;;  %v86_v18 = vmul.f32 0.6931472, %v208_v11 }
  0x2d   :  { %v212_v19 = vpop.eup %211  ;;  %150 = vst [vmem:[#allocation5 + $0x30] sm:$0xff] %v129_v12  ;;  %v131_v20 = vadd.f32 1.0, %v111_v13  ;;  %v113_v21 = vmul.f32 0.25, %v84_v14  ;;  %v88_v22 = vmul.f32 0.6931472, %v210_v15 }
  0x2e   :  { %v214_v23 = vpop.eup %213  ;;  %151 = vst.msk [vmem:[#allocation5 + $0x38] sm:$0xff] %vm144_vm0, %v130_v16  ;;  %v132_v24 = vadd.f32 1.0, %v112_v17  ;;  %v114_v25 = vmul.f32 0.25, %v86_v18  ;;  %v90_v26 = vmul.f32 0.6931472, %v212_v19 }
  0x2f   :  { %v216_v27 = vpop.eup %215  ;;  %152 = vst [vmem:[#allocation5 + $0x40] sm:$0xff] %v131_v20  ;;  %v133_v28 = vadd.f32 1.0, %v113_v21  ;;  %v115_v29 = vmul.f32 0.25, %v88_v22  ;;  %v92_v30 = vmul.f32 0.6931472, %v214_v23 }
  0x30   :  { %v218_v31 = vpop.eup %217  ;;  %153 = vst.msk [vmem:[#allocation5 + $0x48] sm:$0xff] %vm144_vm0, %v132_v24  ;;  %v134_v32 = vadd.f32 1.0, %v114_v25  ;;  %v116_v33 = vmul.f32 0.25, %v90_v26  ;;  %v94_v34 = vmul.f32 0.6931472, %v216_v27 }
  0x31   :  { %v220_v35 = vpop.eup %219  ;;  %154 = vst [vmem:[#allocation5 + $0x50] sm:$0xff] %v133_v28  ;;  %v135_v36 = vadd.f32 1.0, %v115_v29  ;;  %v117_v37 = vmul.f32 0.25, %v92_v30  ;;  %v96_v38 = vmul.f32 0.6931472, %v218_v31 }
  0x32   :  { %v222_v39 = vpop.eup %221  ;;  %155 = vst.msk [vmem:[#allocation5 + $0x58] sm:$0xff] %vm144_vm0, %v134_v32  ;;  %v136_v40 = vadd.f32 1.0, %v116_v33  ;;  %v118_v41 = vmul.f32 0.25, %v94_v34  ;;  %v98_v42 = vmul.f32 0.6931472, %v220_v35 }
  0x33   :  { %v224_v43 = vpop.eup %223  ;;  %156 = vst [vmem:[#allocation5 + $0x60] sm:$0xff] %v135_v36  ;;  %v137_v44 = vadd.f32 1.0, %v117_v37  ;;  %v119_v45 = vmul.f32 0.25, %v96_v38  ;;  %v100_v46 = vmul.f32 0.6931472, %v222_v39 }
  0x34   :  { %157 = vst.msk [vmem:[#allocation5 + $0x68] sm:$0xff] %vm144_vm0, %v136_v40  ;;  %v138_v47 = vadd.f32 1.0, %v118_v41  ;;  %v120_v48 = vmul.f32 0.25, %v98_v42  ;;  %v102_v49 = vmul.f32 0.6931472, %v224_v43 }
  0x35   :  { %158 = vst [vmem:[#allocation5 + $0x70] sm:$0xff] %v137_v44  ;;  %v139_v50 = vadd.f32 1.0, %v119_v45  ;;  %v121_v51 = vmul.f32 0.25, %v100_v46 }
  0x36   :  { %159 = vst.msk [vmem:[#allocation5 + $0x78] sm:$0xff] %vm144_vm0, %v138_v47  ;;  %v140_v52 = vadd.f32 1.0, %v120_v48  ;;  %v122_v53 = vmul.f32 0.25, %v102_v49 }
  0x37   :  { %160 = vst [vmem:[#allocation5 + $0x80] sm:$0xff] %v139_v50  ;;  %v141_v54 = vadd.f32 1.0, %v121_v51 }
  0x38   :  { %161 = vst.msk [vmem:[#allocation5 + $0x88] sm:$0xff] %vm144_vm0, %v140_v52  ;;  %v142_v55 = vadd.f32 1.0, %v122_v53 }
  0x39   :  { %162 = vst [vmem:[#allocation5 + $0x90] sm:$0xff] %v141_v54 }
  0x3a   :  { %163 = vst.msk [vmem:[#allocation5 + $0x98] sm:$0xff] %vm144_vm0, %v142_v55 }
  0x3b   :  { %258 = shalt.err (!%p255_p12)
}
  0x3c   :  { %s259_s24 = scalar_lea.hbm %s328_s1, 2560 }
  0x3d   :  { %p260_p13 = scmp.ne.s32.totalorder %s328_s1, %s259_s24  ;;  %p263_p0 = scmp.lt.u32.totalorder %s259_s24, %s328_s1 }
  0x3f   :  { %p265_p1 = pnand %p263_p0, %p260_p13 }
  0x41   :  { %268 = shalt.err (!%p265_p1)
}
  0x42   :  { %175 = dma.vmem_to_hbm [thread:$0]  %s170_s20, 2560, %s328_s1, [#allocation4], %s274_s16, %s274_s16, %s275_s17  }
  0x43   :  { %271 = dma.done.wait [#allocation4], 2560  }
  0x44   :  { %272 = vsyncadd [#allocation4], 4294964736 }
  0x45   :  { %179 = vsyncpa [#allocation3], 1 }
  0x46   :  { %180 = vsyncpa [#allocation4], 1 }

</bundles_post_ra>
